<compile_context>
chip_gen: v6e
topology: v6e:2x2x1
jax: 0.10.0
libtpu: 0.0.40
codegen_flags: <defaults>
</compile_context>

<pallas_src>
import functools

import jax
import jax.numpy as jnp
from jax import lax
from jax.experimental import pallas as pl
from jax.experimental.pallas import tpu as pltpu

NEG_SLOPE = 0.01
LN_EPS = 1e-5
THETA_EPS = 1e-8
NEG_BIG = -1e30


def _round_up(x, m):
    return ((x + m - 1) // m) * m


def _leaky_relu(x):
    return jnp.where(x >= 0, x, NEG_SLOPE * x)


def _softplus(x):
    # numerically stable softplus
    return jnp.maximum(x, 0.0) + jnp.log1p(jnp.exp(-jnp.abs(x)))


def _layernorm(x, gamma, beta):
    mu = jnp.mean(x, axis=-1, keepdims=True)
    var = jnp.mean((x - mu) ** 2, axis=-1, keepdims=True)
    return (x - mu) * lax.rsqrt(var + LN_EPS) * gamma + beta


def _layernorm_padded(x, gamma, beta, true_dim):
    """LayerNorm over a lane-padded activation.

    Padded lanes of x are exactly 0 (zero-padded weights/bias), so plain sums
    over the padded width equal sums over the true width; divide by the true
    width. gamma/beta are zero-padded, so padded output lanes stay exactly 0.
    """
    inv_n = 1.0 / float(true_dim)
    mean = jnp.sum(x, axis=-1, keepdims=True) * inv_n
    ex2 = jnp.sum(x * x, axis=-1, keepdims=True) * inv_n
    var = jnp.maximum(ex2 - mean * mean, 0.0)
    return (x - mean) * lax.rsqrt(var + LN_EPS) * gamma + beta


def vae_decoder_kernel(
    z_ref, xb_ref, lib_ref,
    w1z_ref, w1b_ref, b1_ref, g1_ref, be1_ref,     # dec_hidden layer 1
    w2_ref, b2_ref, g2_ref, be2_ref,               # dec_hidden layer 2
    wh_ref, bh_ref,                                # fused heads [out | pi | disp]
    scale_ref, theta_ref, rate_ref, pi_ref,
    *, g_true, gp, h1_true, h2_true,
):
    bf16 = jnp.bfloat16

    # --- dec_hidden layer 1: Linear -> LayerNorm -> LeakyReLU ----------------
    # concat([z, x_batch]) @ w1 done as split matmuls (no wrapper-side concat).
    h = (
        jnp.dot(z_ref[...].astype(bf16), w1z_ref[...],
                preferred_element_type=jnp.float32)
        + jnp.dot(xb_ref[...].astype(bf16), w1b_ref[...],
                  preferred_element_type=jnp.float32)
        + b1_ref[...]
    )
    h = _leaky_relu(_layernorm_padded(h, g1_ref[...], be1_ref[...], h1_true))

    # --- dec_hidden layer 2 ---------------------------------------------------
    h = jnp.dot(h.astype(bf16), w2_ref[...],
                preferred_element_type=jnp.float32) + b2_ref[...]
    h = _leaky_relu(_layernorm_padded(h, g2_ref[...], be2_ref[...], h2_true))

    # --- fused output heads: one MXU pass, then static lane slices ------------
    heads = jnp.dot(h.astype(bf16), wh_ref[...],
                    preferred_element_type=jnp.float32) + bh_ref[...]
    out = heads[:, 0:gp]            # self.output
    pi = heads[:, gp:2 * gp]        # self.output_dropout (zinb pi head)
    disp = heads[:, 2 * gp:3 * gp]  # self.output_inverse_dispersion

    # --- px_mu_scale = softmax(out) over the true (unpadded) gene columns -----
    col = lax.broadcasted_iota(jnp.int32, (1, gp), 1)
    logits = jnp.where(col < g_true, out, NEG_BIG)
    m = jnp.max(logits, axis=-1, keepdims=True)
    e = jnp.exp(logits - m)
    denom = jnp.sum(e, axis=-1, keepdims=True)
    r = pl.reciprocal(denom, approx=True)
    r = r * (2.0 - denom * r)          # one Newton refinement step
    scale = e * r

    # px_theta = softplus(disp) + 1e-8 ; px_mu_rate = lib * scale
    theta = _softplus(disp) + THETA_EPS
    rate = lib_ref[...] * scale

    scale_ref[...] = scale
    theta_ref[...] = theta
    rate_ref[...] = rate
    pi_ref[...] = pi


def vae_decoder_forward(z, x_batch, lib, params, *, max_tile_b=256):
    """Wrapper: pads/fuses params, tiles the batch, calls the Pallas kernel.

    For realistic gene counts (G in the thousands) on v7x (64 MiB VMEM), lower
    max_tile_b and/or set pltpu.CompilerParams(vmem_limit_bytes=...) explicitly;
    at the shapes here everything is well under the default scoped limit.
    """
    (w1, b1, g1, be1, w2, b2, g2, be2, wo, bo, wp, bp, wd, bd) = params
    B, latent_dim = z.shape
    nb = x_batch.shape[1]
    h1 = w1.shape[1]
    h2 = w2.shape[1]
    G = wo.shape[1]

    H1P = _round_up(h1, 128)
    H2P = _round_up(h2, 128)
    GP = _round_up(G, 128)

    # Batch tiling: run the whole (sublane-rounded) batch in one grid step when
    # small; otherwise 256-row tiles split "parallel" across TensorCores.
    tile_b = min(max_tile_b, _round_up(B, 8))
    B_pad = _round_up(B, tile_b)
    n_tiles = B_pad // tile_b

    def pad_rows(x):
        return jnp.pad(x, ((0, B_pad - B), (0, 0))) if B_pad != B else x

    z_p = pad_rows(z)
    xb_p = pad_rows(x_batch)
    lib_p = pad_rows(lib)

    def pad2(x, rows, cols):
        r, c = x.shape
        return jnp.pad(x, ((0, rows - r), (0, cols - c)))

    bf16 = jnp.bfloat16

    # Layer 1: split rows (z part / x_batch part), pad cols to 128, cast bf16.
    w1_full = pad2(w1, latent_dim + nb, H1P)
    w1z = w1_full[:latent_dim].astype(bf16)
    w1b = w1_full[latent_dim:].astype(bf16)
    b1_p = pad2(b1, 1, H1P)
    g1_p = pad2(g1, 1, H1P)    # zero-padded -> padded LN output lanes are 0
    be1_p = pad2(be1, 1, H1P)

    # Layer 2.
    w2_p = pad2(w2, H1P, H2P).astype(bf16)
    b2_p = pad2(b2, 1, H2P)
    g2_p = pad2(g2, 1, H2P)
    be2_p = pad2(be2, 1, H2P)

    # Fused heads: [output | output_dropout | inverse_dispersion], lane-padded.
    wh = jnp.concatenate(
        [pad2(wo, h2, GP), pad2(wp, h2, GP), pad2(wd, h2, GP)], axis=1)
    wh = pad2(wh, H2P, 3 * GP).astype(bf16)
    bh = jnp.concatenate(
        [pad2(bo, 1, GP), pad2(bp, 1, GP), pad2(bd, 1, GP)], axis=1)

    batched = lambda cols: pl.BlockSpec((tile_b, cols), lambda i: (i, 0))
    full2d = lambda r, c: pl.BlockSpec((r, c), lambda i: (0, 0))

    in_specs = [
        batched(latent_dim),        # z
        batched(nb),                # x_batch
        batched(1),                 # lib
        full2d(latent_dim, H1P), full2d(nb, H1P),
        full2d(1, H1P), full2d(1, H1P), full2d(1, H1P),
        full2d(H1P, H2P), full2d(1, H2P), full2d(1, H2P), full2d(1, H2P),
        full2d(H2P, 3 * GP), full2d(1, 3 * GP),
    ]
    out_specs = [batched(GP) for _ in range(4)]
    out_shape = [jax.ShapeDtypeStruct((B_pad, GP), jnp.float32) for _ in range(4)]

    kernel = functools.partial(
        vae_decoder_kernel, g_true=G, gp=GP, h1_true=h1, h2_true=h2)

    fn = pl.pallas_call(
        kernel,
        grid=(n_tiles,),
        in_specs=in_specs,
        out_specs=out_specs,
        out_shape=out_shape,
        compiler_params=pltpu.CompilerParams(
            dimension_semantics=("parallel",)),
    )
    outs = fn(z_p, xb_p, lib_p,
              w1z, w1b, b1_p, g1_p, be1_p,
              w2_p, b2_p, g2_p, be2_p,
              wh, bh)
    # Strip batch / lane padding.
    return tuple(o[:B, :G] for o in outs)


def reference_forward_f32(z, x_batch, lib, params):
    """Pure-f32 JAX reference matching the PyTorch module semantics."""
    (w1, b1, g1, be1, w2, b2, g2, be2, wo, bo, wp, bp, wd, bd) = params
    zc = jnp.concatenate([z, x_batch], axis=1)
    h = _leaky_relu(_layernorm(zc @ w1 + b1, g1, be1))
    h = _leaky_relu(_layernorm(h @ w2 + b2, g2, be2))
    out = h @ wo + bo
    pi = h @ wp + bp
    scale = jax.nn.softmax(out, axis=-1)
    theta = jax.nn.softplus(h @ wd + bd) + THETA_EPS
    rate = lib * scale
    return scale, theta, rate, pi


def reference_forward_mixed(z, x_batch, lib, params):
    """Same compute recipe as the kernel (bf16 matmul inputs, f32 accumulation
    and normalization), without padding — tight structural check."""
    (w1, b1, g1, be1, w2, b2, g2, be2, wo, bo, wp, bp, wd, bd) = params
    bf = jnp.bfloat16
    dot = lambda a, w: jnp.dot(a.astype(bf), w.astype(bf),
                               preferred_element_type=jnp.float32)
    zc = jnp.concatenate([z, x_batch], axis=1)
    h = _leaky_relu(_layernorm(dot(zc, w1) + b1, g1, be1))
    h = _leaky_relu(_layernorm(dot(h, w2) + b2, g2, be2))
    out = dot(h, wo) + bo
    pi = dot(h, wp) + bp
    scale = jax.nn.softmax(out, axis=-1)
    theta = _softplus(dot(h, wd) + bd) + THETA_EPS
    rate = lib * scale
    return scale, theta, rate, pi


def init_params(key, d_in, hidden_dims_decoder, input_dim):
    """Deterministic synthetic parameter init (shapes match nn.Linear / nn.LayerNorm)."""
    dims = [d_in] + list(hidden_dims_decoder)
    params = []
    k = key
    # dec_hidden: two [Linear, LayerNorm] blocks
    for i in range(len(hidden_dims_decoder)):
        k, kw, kb = jax.random.split(k, 3)
        fan_in = dims[i]
        w = jax.random.normal(kw, (dims[i], dims[i + 1]), jnp.float32) / jnp.sqrt(fan_in)
        b = 0.01 * jax.random.normal(kb, (1, dims[i + 1]), jnp.float32)
        gamma = jnp.ones((1, dims[i + 1]), jnp.float32)
        beta = jnp.zeros((1, dims[i + 1]), jnp.float32)
        params += [w, b, gamma, beta]
    # output heads: self.output, self.output_dropout, self.output_inverse_dispersion
    h_last = dims[-1]
    for _ in range(3):
        k, kw, kb = jax.random.split(k, 3)
        w = jax.random.normal(kw, (h_last, input_dim), jnp.float32) / jnp.sqrt(h_last)
        b = 0.01 * jax.random.normal(kb, (1, input_dim), jnp.float32)
        params += [w, b]
    return tuple(params)


if __name__ == "__main__":
    # Small shapes consistent with the module
    B = 16                 # batch (cells)
    latent_dim = 16
    input_batch_num = 4    # one-hot batch covariate width
    hidden_dim = [32, 64]  # as passed to __init__; decoder uses np.flip -> [64, 32]
    hidden_dim_decoder = list(reversed(hidden_dim))
    input_dim = 200        # genes

    key = jax.random.PRNGKey(0)
    kz, kb, kl, kp = jax.random.split(key, 4)

    z = jax.random.normal(kz, (B, latent_dim), jnp.float32)
    batch_idx = jax.random.randint(kb, (B,), 0, input_batch_num)
    x_batch = jax.nn.one_hot(batch_idx, input_batch_num, dtype=jnp.float32)
    lib = jnp.exp(jax.random.normal(kl, (B, 1), jnp.float32)) * 100.0  # library size
    latent_lib = None  # infer_library_size=False  # TODO(synk): latent_lib branch unused with defaults

    d_in = latent_dim + input_batch_num
    params = init_params(kp, d_in, hidden_dim_decoder, input_dim)

    outs = vae_decoder_forward(z, x_batch, lib, params)
    outs = jax.block_until_ready(outs)

    refs_mixed = reference_forward_mixed(z, x_batch, lib, params)
    refs_f32 = reference_forward_f32(z, x_batch, lib, params)
    names = ["px_mu_scale", "px_theta", "px_mu_rate", "px_pi"]
    for name, o, rm, rf in zip(names, outs, refs_mixed, refs_f32):
        assert o.shape == (B, input_dim), (name, o.shape)
        # tight structural check vs a bf16-matched reference
        err_m = float(jnp.max(jnp.abs(o - rm)))
        rel_m = err_m / (float(jnp.max(jnp.abs(rm))) + 1e-12)
        assert rel_m < 2e-3, ("mixed", name, err_m, rel_m)
        # fidelity check vs the pure-f32 PyTorch-equivalent reference
        err_f = float(jnp.max(jnp.abs(o - rf)))
        rel_f = err_f / (float(jnp.max(jnp.abs(rf))) + 1e-12)
        assert rel_f < 5e-2, ("f32", name, err_f, rel_f)

    print("KERNEL_OK")
</pallas_src>

<mosaic_0001>
module attributes {stable_mosaic.version = 11 : i64} {
  func.func @vae_decoder_kernel(%arg0: i32, %arg1: memref<16x16xf32, #tpu.memory_space<vmem>>, %arg2: memref<16x4xf32, #tpu.memory_space<vmem>>, %arg3: memref<16x1xf32, #tpu.memory_space<vmem>>, %arg4: memref<16x128xbf16, #tpu.memory_space<vmem>>, %arg5: memref<4x128xbf16, #tpu.memory_space<vmem>>, %arg6: memref<1x128xf32, #tpu.memory_space<vmem>>, %arg7: memref<1x128xf32, #tpu.memory_space<vmem>>, %arg8: memref<1x128xf32, #tpu.memory_space<vmem>>, %arg9: memref<128x128xbf16, #tpu.memory_space<vmem>>, %arg10: memref<1x128xf32, #tpu.memory_space<vmem>>, %arg11: memref<1x128xf32, #tpu.memory_space<vmem>>, %arg12: memref<1x128xf32, #tpu.memory_space<vmem>>, %arg13: memref<128x768xbf16, #tpu.memory_space<vmem>>, %arg14: memref<1x768xf32, #tpu.memory_space<vmem>>, %arg15: memref<16x256xf32, #tpu.memory_space<vmem>>, %arg16: memref<16x256xf32, #tpu.memory_space<vmem>>, %arg17: memref<16x256xf32, #tpu.memory_space<vmem>>, %arg18: memref<16x256xf32, #tpu.memory_space<vmem>>) attributes {dimension_semantics = [#tpu.dimension_semantics<parallel>], iteration_bounds = array<i64: 1>, scalar_prefetch = 0 : i64, scratch_operands = 0 : i64, tpu.core_type = #tpu.core_type<tc>, window_params = [{transform_indices = @transform_0, window_bounds = array<i64: 16, 16>}, {transform_indices = @transform_1, window_bounds = array<i64: 16, 4>}, {transform_indices = @transform_2, window_bounds = array<i64: 16, 1>}, {pipeline_mode = #tpu.pipeline_mode<synchronous>, transform_indices = @transform_3, window_bounds = array<i64: 16, 128>}, {pipeline_mode = #tpu.pipeline_mode<synchronous>, transform_indices = @transform_4, window_bounds = array<i64: 4, 128>}, {pipeline_mode = #tpu.pipeline_mode<synchronous>, transform_indices = @transform_5, window_bounds = array<i64: 1, 128>}, {pipeline_mode = #tpu.pipeline_mode<synchronous>, transform_indices = @transform_6, window_bounds = array<i64: 1, 128>}, {pipeline_mode = #tpu.pipeline_mode<synchronous>, transform_indices = @transform_7, window_bounds = array<i64: 1, 128>}, {pipeline_mode = #tpu.pipeline_mode<synchronous>, transform_indices = @transform_8, window_bounds = array<i64: 128, 128>}, {pipeline_mode = #tpu.pipeline_mode<synchronous>, transform_indices = @transform_9, window_bounds = array<i64: 1, 128>}, {pipeline_mode = #tpu.pipeline_mode<synchronous>, transform_indices = @transform_10, window_bounds = array<i64: 1, 128>}, {pipeline_mode = #tpu.pipeline_mode<synchronous>, transform_indices = @transform_11, window_bounds = array<i64: 1, 128>}, {pipeline_mode = #tpu.pipeline_mode<synchronous>, transform_indices = @transform_12, window_bounds = array<i64: 128, 768>}, {pipeline_mode = #tpu.pipeline_mode<synchronous>, transform_indices = @transform_13, window_bounds = array<i64: 1, 768>}, {transform_indices = @transform_14, window_bounds = array<i64: 16, 256>}, {transform_indices = @transform_15, window_bounds = array<i64: 16, 256>}, {transform_indices = @transform_16, window_bounds = array<i64: 16, 256>}, {transform_indices = @transform_17, window_bounds = array<i64: 16, 256>}]} {
    %c0 = arith.constant 0 : index
    %c0_0 = arith.constant 0 : index
    %0 = vector.load %arg1[%c0, %c0_0] : memref<16x16xf32, #tpu.memory_space<vmem>>, vector<16x16xf32>
    %1 = arith.truncf %0 : vector<16x16xf32> to vector<16x16xbf16>
    %c0_1 = arith.constant 0 : index
    %c0_2 = arith.constant 0 : index
    %2 = vector.load %arg4[%c0_1, %c0_2] : memref<16x128xbf16, #tpu.memory_space<vmem>>, vector<16x128xbf16>
    %cst = arith.constant dense<0.000000e+00> : vector<16x128xf32>
    %3 = tpu.matmul %1, %2, %cst {dimension_numbers = #tpu.dot_dimension_numbers<[1], [0], [0], [1], [0, 0, 1, 1], [], []>} : vector<16x16xbf16>, vector<16x128xbf16>, vector<16x128xf32> -> vector<16x128xf32>
    %c0_3 = arith.constant 0 : index
    %c0_4 = arith.constant 0 : index
    %4 = vector.load %arg2[%c0_3, %c0_4] : memref<16x4xf32, #tpu.memory_space<vmem>>, vector<16x4xf32>
    %5 = arith.truncf %4 : vector<16x4xf32> to vector<16x4xbf16>
    %c0_5 = arith.constant 0 : index
    %c0_6 = arith.constant 0 : index
    %6 = vector.load %arg5[%c0_5, %c0_6] : memref<4x128xbf16, #tpu.memory_space<vmem>>, vector<4x128xbf16>
    %cst_7 = arith.constant dense<0.000000e+00> : vector<16x128xf32>
    %7 = tpu.matmul %5, %6, %cst_7 {dimension_numbers = #tpu.dot_dimension_numbers<[1], [0], [0], [1], [0, 0, 1, 1], [], []>} : vector<16x4xbf16>, vector<4x128xbf16>, vector<16x128xf32> -> vector<16x128xf32>
    %8 = arith.addf %3, %7 : vector<16x128xf32>
    %c0_8 = arith.constant 0 : index
    %c0_9 = arith.constant 0 : index
    %9 = vector.load %arg6[%c0_8, %c0_9] : memref<1x128xf32, #tpu.memory_space<vmem>>, vector<1x128xf32>
    %10 = vector.broadcast %9 : vector<1x128xf32> to vector<16x128xf32>
    %11 = arith.addf %8, %10 : vector<16x128xf32>
    %c0_10 = arith.constant 0 : index
    %c0_11 = arith.constant 0 : index
    %12 = vector.load %arg7[%c0_10, %c0_11] : memref<1x128xf32, #tpu.memory_space<vmem>>, vector<1x128xf32>
    %c0_12 = arith.constant 0 : index
    %c0_13 = arith.constant 0 : index
    %13 = vector.load %arg8[%c0_12, %c0_13] : memref<1x128xf32, #tpu.memory_space<vmem>>, vector<1x128xf32>
    %cst_14 = arith.constant dense<0.000000e+00> : vector<16xf32>
    %14 = vector.multi_reduction <add>, %11, %cst_14 [1] : vector<16x128xf32> to vector<16xf32>
    %15 = vector.shape_cast %14 : vector<16xf32> to vector<16x1xf32>
    %cst_15 = arith.constant 1.562500e-02 : f32
    %16 = vector.broadcast %cst_15 : f32 to vector<16x1xf32>
    %17 = arith.mulf %15, %16 : vector<16x1xf32>
    %18 = arith.mulf %11, %11 : vector<16x128xf32>
    %cst_16 = arith.constant dense<0.000000e+00> : vector<16xf32>
    %19 = vector.multi_reduction <add>, %18, %cst_16 [1] : vector<16x128xf32> to vector<16xf32>
    %20 = vector.shape_cast %19 : vector<16xf32> to vector<16x1xf32>
    %cst_17 = arith.constant 1.562500e-02 : f32
    %21 = vector.broadcast %cst_17 : f32 to vector<16x1xf32>
    %22 = arith.mulf %20, %21 : vector<16x1xf32>
    %23 = arith.mulf %17, %17 : vector<16x1xf32>
    %24 = arith.subf %22, %23 : vector<16x1xf32>
    %cst_18 = arith.constant 0.000000e+00 : f32
    %25 = vector.broadcast %cst_18 : f32 to vector<16x1xf32>
    %26 = arith.maximumf %24, %25 : vector<16x1xf32>
    %27 = vector.broadcast %17 : vector<16x1xf32> to vector<16x128xf32>
    %28 = arith.subf %11, %27 : vector<16x128xf32>
    %cst_19 = arith.constant 9.99999974E-6 : f32
    %29 = vector.broadcast %cst_19 : f32 to vector<16x1xf32>
    %30 = arith.addf %26, %29 : vector<16x1xf32>
    %31 = math.rsqrt %30 : vector<16x1xf32>
    %32 = vector.broadcast %31 : vector<16x1xf32> to vector<16x128xf32>
    %33 = arith.mulf %28, %32 : vector<16x128xf32>
    %34 = vector.broadcast %12 : vector<1x128xf32> to vector<16x128xf32>
    %35 = arith.mulf %33, %34 : vector<16x128xf32>
    %36 = vector.broadcast %13 : vector<1x128xf32> to vector<16x128xf32>
    %37 = arith.addf %35, %36 : vector<16x128xf32>
    %cst_20 = arith.constant 0.000000e+00 : f32
    %38 = vector.broadcast %cst_20 : f32 to vector<16x128xf32>
    %39 = arith.cmpf oge, %37, %38 : vector<16x128xf32>
    %cst_21 = arith.constant 0.00999999977 : f32
    %40 = vector.broadcast %cst_21 : f32 to vector<16x128xf32>
    %41 = arith.mulf %40, %37 : vector<16x128xf32>
    %42 = arith.select %39, %37, %41 : vector<16x128xi1>, vector<16x128xf32>
    %43 = arith.truncf %42 : vector<16x128xf32> to vector<16x128xbf16>
    %c0_22 = arith.constant 0 : index
    %c0_23 = arith.constant 0 : index
    %44 = vector.load %arg9[%c0_22, %c0_23] : memref<128x128xbf16, #tpu.memory_space<vmem>>, vector<128x128xbf16>
    %cst_24 = arith.constant dense<0.000000e+00> : vector<16x128xf32>
    %45 = tpu.matmul %43, %44, %cst_24 {dimension_numbers = #tpu.dot_dimension_numbers<[1], [0], [0], [1], [0, 0, 1, 1], [], []>} : vector<16x128xbf16>, vector<128x128xbf16>, vector<16x128xf32> -> vector<16x128xf32>
    %c0_25 = arith.constant 0 : index
    %c0_26 = arith.constant 0 : index
    %46 = vector.load %arg10[%c0_25, %c0_26] : memref<1x128xf32, #tpu.memory_space<vmem>>, vector<1x128xf32>
    %47 = vector.broadcast %46 : vector<1x128xf32> to vector<16x128xf32>
    %48 = arith.addf %45, %47 : vector<16x128xf32>
    %c0_27 = arith.constant 0 : index
    %c0_28 = arith.constant 0 : index
    %49 = vector.load %arg11[%c0_27, %c0_28] : memref<1x128xf32, #tpu.memory_space<vmem>>, vector<1x128xf32>
    %c0_29 = arith.constant 0 : index
    %c0_30 = arith.constant 0 : index
    %50 = vector.load %arg12[%c0_29, %c0_30] : memref<1x128xf32, #tpu.memory_space<vmem>>, vector<1x128xf32>
    %cst_31 = arith.constant dense<0.000000e+00> : vector<16xf32>
    %51 = vector.multi_reduction <add>, %48, %cst_31 [1] : vector<16x128xf32> to vector<16xf32>
    %52 = vector.shape_cast %51 : vector<16xf32> to vector<16x1xf32>
    %cst_32 = arith.constant 3.125000e-02 : f32
    %53 = vector.broadcast %cst_32 : f32 to vector<16x1xf32>
    %54 = arith.mulf %52, %53 : vector<16x1xf32>
    %55 = arith.mulf %48, %48 : vector<16x128xf32>
    %cst_33 = arith.constant dense<0.000000e+00> : vector<16xf32>
    %56 = vector.multi_reduction <add>, %55, %cst_33 [1] : vector<16x128xf32> to vector<16xf32>
    %57 = vector.shape_cast %56 : vector<16xf32> to vector<16x1xf32>
    %cst_34 = arith.constant 3.125000e-02 : f32
    %58 = vector.broadcast %cst_34 : f32 to vector<16x1xf32>
    %59 = arith.mulf %57, %58 : vector<16x1xf32>
    %60 = arith.mulf %54, %54 : vector<16x1xf32>
    %61 = arith.subf %59, %60 : vector<16x1xf32>
    %cst_35 = arith.constant 0.000000e+00 : f32
    %62 = vector.broadcast %cst_35 : f32 to vector<16x1xf32>
    %63 = arith.maximumf %61, %62 : vector<16x1xf32>
    %64 = vector.broadcast %54 : vector<16x1xf32> to vector<16x128xf32>
    %65 = arith.subf %48, %64 : vector<16x128xf32>
    %cst_36 = arith.constant 9.99999974E-6 : f32
    %66 = vector.broadcast %cst_36 : f32 to vector<16x1xf32>
    %67 = arith.addf %63, %66 : vector<16x1xf32>
    %68 = math.rsqrt %67 : vector<16x1xf32>
    %69 = vector.broadcast %68 : vector<16x1xf32> to vector<16x128xf32>
    %70 = arith.mulf %65, %69 : vector<16x128xf32>
    %71 = vector.broadcast %49 : vector<1x128xf32> to vector<16x128xf32>
    %72 = arith.mulf %70, %71 : vector<16x128xf32>
    %73 = vector.broadcast %50 : vector<1x128xf32> to vector<16x128xf32>
    %74 = arith.addf %72, %73 : vector<16x128xf32>
    %cst_37 = arith.constant 0.000000e+00 : f32
    %75 = vector.broadcast %cst_37 : f32 to vector<16x128xf32>
    %76 = arith.cmpf oge, %74, %75 : vector<16x128xf32>
    %cst_38 = arith.constant 0.00999999977 : f32
    %77 = vector.broadcast %cst_38 : f32 to vector<16x128xf32>
    %78 = arith.mulf %77, %74 : vector<16x128xf32>
    %79 = arith.select %76, %74, %78 : vector<16x128xi1>, vector<16x128xf32>
    %80 = arith.truncf %79 : vector<16x128xf32> to vector<16x128xbf16>
    %c0_39 = arith.constant 0 : index
    %c0_40 = arith.constant 0 : index
    %81 = vector.load %arg13[%c0_39, %c0_40] : memref<128x768xbf16, #tpu.memory_space<vmem>>, vector<128x768xbf16>
    %cst_41 = arith.constant dense<0.000000e+00> : vector<16x768xf32>
    %82 = tpu.matmul %80, %81, %cst_41 {dimension_numbers = #tpu.dot_dimension_numbers<[1], [0], [0], [1], [0, 0, 1, 1], [], []>} : vector<16x128xbf16>, vector<128x768xbf16>, vector<16x768xf32> -> vector<16x768xf32>
    %c0_42 = arith.constant 0 : index
    %c0_43 = arith.constant 0 : index
    %83 = vector.load %arg14[%c0_42, %c0_43] : memref<1x768xf32, #tpu.memory_space<vmem>>, vector<1x768xf32>
    %84 = vector.broadcast %83 : vector<1x768xf32> to vector<16x768xf32>
    %85 = arith.addf %82, %84 : vector<16x768xf32>
    %86 = vector.extract_strided_slice %85 {offsets = [0, 0], sizes = [16, 256], strides = [1, 1]} : vector<16x768xf32> to vector<16x256xf32>
    %87 = vector.extract_strided_slice %85 {offsets = [0, 256], sizes = [16, 256], strides = [1, 1]} : vector<16x768xf32> to vector<16x256xf32>
    %88 = vector.extract_strided_slice %85 {offsets = [0, 512], sizes = [16, 256], strides = [1, 1]} : vector<16x768xf32> to vector<16x256xf32>
    %89 = tpu.iota {dimensions = array<i32: 1>} : vector<1x256xi32>
    %c200_i32 = arith.constant 200 : i32
    %90 = vector.broadcast %c200_i32 : i32 to vector<1x256xi32>
    %91 = arith.cmpi slt, %89, %90 : vector<1x256xi32>
    %cst_44 = arith.constant -1.000000e+30 : f32
    %92 = vector.shape_cast %91 : vector<1x256xi1> to vector<1x256xi1>
    %93 = vector.broadcast %92 : vector<1x256xi1> to vector<16x256xi1>
    %94 = vector.broadcast %cst_44 : f32 to vector<16x256xf32>
    %95 = arith.select %93, %86, %94 : vector<16x256xi1>, vector<16x256xf32>
    %cst_45 = arith.constant dense<0xFF800000> : vector<16xf32>
    %96 = vector.multi_reduction <maximumf>, %95, %cst_45 [1] : vector<16x256xf32> to vector<16xf32>
    %97 = vector.shape_cast %96 : vector<16xf32> to vector<16x1xf32>
    %98 = vector.broadcast %97 : vector<16x1xf32> to vector<16x256xf32>
    %99 = arith.subf %95, %98 : vector<16x256xf32>
    %100 = math.exp %99 : vector<16x256xf32>
    %cst_46 = arith.constant dense<0.000000e+00> : vector<16xf32>
    %101 = vector.multi_reduction <add>, %100, %cst_46 [1] : vector<16x256xf32> to vector<16xf32>
    %102 = vector.shape_cast %101 : vector<16xf32> to vector<16x1xf32>
    %103 = tpu.reciprocal %102 {approx = true} : vector<16x1xf32> -> vector<16x1xf32>
    %104 = arith.mulf %102, %103 : vector<16x1xf32>
    %cst_47 = arith.constant 2.000000e+00 : f32
    %105 = vector.broadcast %cst_47 : f32 to vector<16x1xf32>
    %106 = arith.subf %105, %104 : vector<16x1xf32>
    %107 = arith.mulf %103, %106 : vector<16x1xf32>
    %108 = vector.broadcast %107 : vector<16x1xf32> to vector<16x256xf32>
    %109 = arith.mulf %100, %108 : vector<16x256xf32>
    %cst_48 = arith.constant 0.000000e+00 : f32
    %110 = vector.broadcast %cst_48 : f32 to vector<16x256xf32>
    %111 = arith.maximumf %88, %110 : vector<16x256xf32>
    %112 = math.absf %88 : vector<16x256xf32>
    %cst_49 = arith.constant 0.000000e+00 : f32
    %113 = vector.broadcast %cst_49 : f32 to vector<16x256xf32>
    %114 = arith.subf %113, %112 : vector<16x256xf32>
    %115 = math.exp %114 : vector<16x256xf32>
    %116 = math.log1p %115 : vector<16x256xf32>
    %117 = arith.addf %111, %116 : vector<16x256xf32>
    %cst_50 = arith.constant 9.99999993E-9 : f32
    %118 = vector.broadcast %cst_50 : f32 to vector<16x256xf32>
    %119 = arith.addf %117, %118 : vector<16x256xf32>
    %c0_51 = arith.constant 0 : index
    %c0_52 = arith.constant 0 : index
    %120 = vector.load %arg3[%c0_51, %c0_52] : memref<16x1xf32, #tpu.memory_space<vmem>>, vector<16x1xf32>
    %121 = vector.broadcast %120 : vector<16x1xf32> to vector<16x256xf32>
    %122 = arith.mulf %121, %109 : vector<16x256xf32>
    %c0_53 = arith.constant 0 : index
    %c0_54 = arith.constant 0 : index
    %123 = vector.load %arg15[%c0_53, %c0_54] : memref<16x256xf32, #tpu.memory_space<vmem>>, vector<16x256xf32>
    tpu.vector_store %arg15[%c0_53, %c0_54], %109 {strides = array<i32>} : memref<16x256xf32, #tpu.memory_space<vmem>>, vector<16x256xf32>,
    %c0_55 = arith.constant 0 : index
    %c0_56 = arith.constant 0 : index
    %124 = vector.load %arg16[%c0_55, %c0_56] : memref<16x256xf32, #tpu.memory_space<vmem>>, vector<16x256xf32>
    tpu.vector_store %arg16[%c0_55, %c0_56], %119 {strides = array<i32>} : memref<16x256xf32, #tpu.memory_space<vmem>>, vector<16x256xf32>,
    %c0_57 = arith.constant 0 : index
    %c0_58 = arith.constant 0 : index
    %125 = vector.load %arg17[%c0_57, %c0_58] : memref<16x256xf32, #tpu.memory_space<vmem>>, vector<16x256xf32>
    tpu.vector_store %arg17[%c0_57, %c0_58], %122 {strides = array<i32>} : memref<16x256xf32, #tpu.memory_space<vmem>>, vector<16x256xf32>,
    %c0_59 = arith.constant 0 : index
    %c0_60 = arith.constant 0 : index
    %126 = vector.load %arg18[%c0_59, %c0_60] : memref<16x256xf32, #tpu.memory_space<vmem>>, vector<16x256xf32>
    tpu.vector_store %arg18[%c0_59, %c0_60], %87 {strides = array<i32>} : memref<16x256xf32, #tpu.memory_space<vmem>>, vector<16x256xf32>,
    return
  }
  func.func @transform_0(%arg0: i32) -> (i32, i32) {
    %c0_i32 = arith.constant 0 : i32
    %c0_i32_0 = arith.constant 0 : i32
    return %arg0, %c0_i32 : i32, i32
  }
  func.func @transform_1(%arg0: i32) -> (i32, i32) {
    %c0_i32 = arith.constant 0 : i32
    %c0_i32_0 = arith.constant 0 : i32
    return %arg0, %c0_i32 : i32, i32
  }
  func.func @transform_2(%arg0: i32) -> (i32, i32) {
    %c0_i32 = arith.constant 0 : i32
    %c0_i32_0 = arith.constant 0 : i32
    return %arg0, %c0_i32 : i32, i32
  }
  func.func @transform_3(%arg0: i32) -> (i32, i32) {
    %c0_i32 = arith.constant 0 : i32
    %c0_i32_0 = arith.constant 0 : i32
    %c0_i32_1 = arith.constant 0 : i32
    return %c0_i32, %c0_i32_0 : i32, i32
  }
  func.func @transform_4(%arg0: i32) -> (i32, i32) {
    %c0_i32 = arith.constant 0 : i32
    %c0_i32_0 = arith.constant 0 : i32
    %c0_i32_1 = arith.constant 0 : i32
    return %c0_i32, %c0_i32_0 : i32, i32
  }
  func.func @transform_5(%arg0: i32) -> (i32, i32) {
    %c0_i32 = arith.constant 0 : i32
    %c0_i32_0 = arith.constant 0 : i32
    %c0_i32_1 = arith.constant 0 : i32
    return %c0_i32, %c0_i32_0 : i32, i32
  }
  func.func @transform_6(%arg0: i32) -> (i32, i32) {
    %c0_i32 = arith.constant 0 : i32
    %c0_i32_0 = arith.constant 0 : i32
    %c0_i32_1 = arith.constant 0 : i32
    return %c0_i32, %c0_i32_0 : i32, i32
  }
  func.func @transform_7(%arg0: i32) -> (i32, i32) {
    %c0_i32 = arith.constant 0 : i32
    %c0_i32_0 = arith.constant 0 : i32
    %c0_i32_1 = arith.constant 0 : i32
    return %c0_i32, %c0_i32_0 : i32, i32
  }
  func.func @transform_8(%arg0: i32) -> (i32, i32) {
    %c0_i32 = arith.constant 0 : i32
    %c0_i32_0 = arith.constant 0 : i32
    %c0_i32_1 = arith.constant 0 : i32
    return %c0_i32, %c0_i32_0 : i32, i32
  }
  func.func @transform_9(%arg0: i32) -> (i32, i32) {
    %c0_i32 = arith.constant 0 : i32
    %c0_i32_0 = arith.constant 0 : i32
    %c0_i32_1 = arith.constant 0 : i32
    return %c0_i32, %c0_i32_0 : i32, i32
  }
  func.func @transform_10(%arg0: i32) -> (i32, i32) {
    %c0_i32 = arith.constant 0 : i32
    %c0_i32_0 = arith.constant 0 : i32
    %c0_i32_1 = arith.constant 0 : i32
    return %c0_i32, %c0_i32_0 : i32, i32
  }
  func.func @transform_11(%arg0: i32) -> (i32, i32) {
    %c0_i32 = arith.constant 0 : i32
    %c0_i32_0 = arith.constant 0 : i32
    %c0_i32_1 = arith.constant 0 : i32
    return %c0_i32, %c0_i32_0 : i32, i32
  }
  func.func @transform_12(%arg0: i32) -> (i32, i32) {
    %c0_i32 = arith.constant 0 : i32
    %c0_i32_0 = arith.constant 0 : i32
    %c0_i32_1 = arith.constant 0 : i32
    return %c0_i32, %c0_i32_0 : i32, i32
  }
  func.func @transform_13(%arg0: i32) -> (i32, i32) {
    %c0_i32 = arith.constant 0 : i32
    %c0_i32_0 = arith.constant 0 : i32
    %c0_i32_1 = arith.constant 0 : i32
    return %c0_i32, %c0_i32_0 : i32, i32
  }
  func.func @transform_14(%arg0: i32) -> (i32, i32) {
    %c0_i32 = arith.constant 0 : i32
    %c0_i32_0 = arith.constant 0 : i32
    return %arg0, %c0_i32 : i32, i32
  }
  func.func @transform_15(%arg0: i32) -> (i32, i32) {
    %c0_i32 = arith.constant 0 : i32
    %c0_i32_0 = arith.constant 0 : i32
    return %arg0, %c0_i32 : i32, i32
  }
  func.func @transform_16(%arg0: i32) -> (i32, i32) {
    %c0_i32 = arith.constant 0 : i32
    %c0_i32_0 = arith.constant 0 : i32
    return %arg0, %c0_i32 : i32, i32
  }
  func.func @transform_17(%arg0: i32) -> (i32, i32) {
    %c0_i32 = arith.constant 0 : i32
    %c0_i32_0 = arith.constant 0 : i32
    return %arg0, %c0_i32 : i32, i32
  }
}

</mosaic_0001>

<bundles_post_ra>
// kernel: tpu_custom_call.1
= control target key start
LH: loop header
LB: loop body
LE: loop exit
PB: predicated region body
PF: predicated region fallthrough
CT: control target
= control target key end

     0   :  { %s1691_s0 = inlined_call_operand.vmem [shape: f32[16,16], index: 0, kind: input, shape index: {}]   ;;  %s1692_s1 = inlined_call_operand.vmem [shape: f32[16,4], index: 1, kind: input, shape index: {}]   ;;  %s1693_s2 = inlined_call_operand.vmem [shape: f32[16,1], index: 2, kind: input, shape index: {}]   ;;  %s1694_s3 = inlined_call_operand.vmem [shape: bf16[16,128], index: 3, kind: input, shape index: {}]   ;;  %s1695_s4 = inlined_call_operand.vmem [shape: bf16[4,128], index: 4, kind: input, shape index: {}]   ;;  %s1696_s5 = inlined_call_operand.vmem [shape: f32[1,128], index: 5, kind: input, shape index: {}]   ;;  %s1697_s6 = inlined_call_operand.vmem [shape: f32[1,128], index: 6, kind: input, shape index: {}]   ;;  %s1698_s7 = inlined_call_operand.vmem [shape: f32[1,128], index: 7, kind: input, shape index: {}]   ;;  %s1699_s8 = inlined_call_operand.hbm [shape: bf16[128,128], index: 8, kind: input, shape index: {}]   ;;  %s1700_s9 = inlined_call_operand.vmem [shape: f32[1,128], index: 9, kind: input, shape index: {}]   ;;  %s1701_s10 = inlined_call_operand.vmem [shape: f32[1,128], index: 10, kind: input, shape index: {}]   ;;  %s1702_s11 = inlined_call_operand.vmem [shape: f32[1,128], index: 11, kind: input, shape index: {}]   ;;  %s1703_s12 = inlined_call_operand.hbm [shape: bf16[128,768], index: 12, kind: input, shape index: {}]   ;;  %s1704_s13 = inlined_call_operand.vmem [shape: f32[1,768], index: 13, kind: input, shape index: {}]   ;;  %s1705_s14 = inlined_call_operand.hbm [shape: f32[16,256], index: 14, kind: output, shape index: {0}]   ;;  %s1706_s15 = inlined_call_operand.hbm [shape: f32[16,256], index: 15, kind: output, shape index: {1}]   ;;  %s1707_s16 = inlined_call_operand.hbm [shape: f32[16,256], index: 16, kind: output, shape index: {2}]   ;;  %s1708_s17 = inlined_call_operand.hbm [shape: f32[16,256], index: 17, kind: output, shape index: {3}]  }
   0x1   :  { %1711 = sst [smem:[#allocation18_spill]] %s1691_s0 }
   0x2   :  { %1712 = sst [smem:[#allocation19_spill]] %s1692_s1 }
   0x3   :  { %23 = vsyncpa [#allocation3], 0 }
   0x4   :  { %24 = vsyncpa [#allocation6], 0 }
   0x5   :  { %25 = vsyncpa [#allocation4], 0 }
   0x6   :  { %26 = vsyncpa [#allocation9], 0 }
   0x7   :  { %27 = vsyncpa [#allocation12], 0  ;;  %s1452_s24 = smov [#allocation2]  }
   0x8   :  { %s49_s25 = sshll.u32 %s1452_s24, 4  ;;  %s50_s25 = int_to_ptr.vmem [resolvable:$true] %s49_s25 }
   0x9   :  { %s1330_s26 = scalar_lea.vmem %s50_s25, 1024  ;;  %p1335_p1 = scmp.lt.s32.totalorder %s50_s25, %s50_s25 }
   0xa   :  { %p1331_p0 = scmp.ne.s32.totalorder %s50_s25, %s1330_s26  ;;  %p1336_p2 = scmp.lt.s32.totalorder %s1330_s26, %s1330_s26 }
   0xc   :  { %p1337_p3 = por %p1336_p2, %p1335_p1 }
   0xe   :  { %p1338_p4 = pnand %p1337_p3, %p1331_p0 }
  0x10   :  { %1341 = shalt.err (!%p1338_p4)
}
  0x11   :  { %s1453_s27 = smov 64   ;;  %s1454_s28 = smov 4  }
  0x12   :  { %55 = dma.hbm_to_vmem [thread:$0]  %s1699_s8, 1024, %s50_s25, [#allocation3], %s1453_s27, %s1453_s27, %s1454_s28  }
  0x13   :  { %s1455_s30 = smov [#allocation5]  }
  0x14   :  { %s67_s18 = sshll.u32 %s1455_s30, 4  ;;  %s68_s18 = int_to_ptr.vmem [resolvable:$true] %s67_s18 }
  0x15   :  { %s1350_s19 = scalar_lea.vmem %s68_s18, 6144  ;;  %p1355_p6 = scmp.lt.s32.totalorder %s68_s18, %s68_s18 }
  0x16   :  { %p1351_p5 = scmp.ne.s32.totalorder %s68_s18, %s1350_s19  ;;  %p1356_p7 = scmp.lt.s32.totalorder %s1350_s19, %s1350_s19 }
  0x18   :  { %p1357_p8 = por %p1356_p7, %p1355_p6 }
  0x1a   :  { %p1358_p9 = pnand %p1357_p8, %p1351_p5 }
  0x1c   :  { %1361 = shalt.err (!%p1358_p9)
}
  0x1d   :  { %s1456_s1 = smov 384   ;;  %s1457_s20 = smov 24  }
  0x1e   :  { %73 = dma.hbm_to_vmem [thread:$0]  %s1703_s12, 6144, %s68_s18, [#allocation6], %s1456_s1, %s1456_s1, %s1457_s20  }
  0x1f   :  { %1442 = dma.done.wait [#allocation3], 1024  }
  0x20   :  { %1443 = vsyncadd [#allocation3], 4294966272 }
  0x21   :  { %1444 = dma.done.wait [#allocation6], 6144  }
  0x22   :  { %1445 = vsyncadd [#allocation6], 4294961152  ;;  %v1458_v0 = vmov 0.0   ;;  %vm1459_vm0 = vmmov 0   ;;  %vm96_vm1 = vcmask 1041408   ;;  %v1205_v3 = vld [vmem:[%s1694_s3] sm:$0xff]  }
  0x23   :  { %1156 = vmatprep.subr.bf16.mxu0 %v1458_v0  ;;  %1162 = vmatprep.subr.bf16.mxu1 %v1458_v0  ;;  %v91_v1 = vld [vmem:[%s1695_s4] sm:$0x3]  ;;  %s1713_s27 = sld [smem:[#allocation19_spill]]  ;;  %vm92_vm2 = vcmask 31744   ;;  %vm147_vm3 = vcmask 130048   ;;  %v1206_v25 = vld [vmem:[#allocation2 + $0x38] sm:$0xff]  }
  0x24   :  { %1158 = vmatprep.mubr.msk.bf16.mxu0 %vm1459_vm0, %v1458_v0  ;;  %1164 = vmatprep.mubr.msk.bf16.mxu1 %vm1459_vm0, %v1458_v0  ;;  %v98_v2 = vsel %vm96_vm1, %v91_v1, 0  ;;  %s1714_s18 = sld [smem:[#allocation18_spill]]  ;;  %v1081_v12 = vld [vmem:[%s1696_s5] ss:$0 sm:$0xff]  ;;  %v1207_v26 = vld [vmem:[#allocation2 + $0x30] sm:$0xff]   ;;  %v1208_v27 = vld [vmem:[#allocation2 + $0x28] sm:$0xff]  }
  0x25   :  { %1157 = vmatpush3.bf16.msra.mxu0 %v98_v2  ;;  %1163 = vmatpush3.bf16.msra.mxu1 %v1205_v3  ;;  %v1209_v28 = vld [vmem:[#allocation2 + $0x20] sm:$0xff]   ;;  %v1210_v29 = vld [vmem:[#allocation2 + $0x18] sm:$0xff]   ;;  %v1211_v30 = vld [vmem:[#allocation2 + $0x10] sm:$0xff]  }
  0x26   :  { %1168 = vmatprep.subr.bf16.mxu0 %v1458_v0  ;;  %v1212_v31 = vld [vmem:[#allocation2 + $0x8] sm:$0xff]   ;;  %v1213_v32 = vld [vmem:[#allocation2] sm:$0xff]  }
  0x27   :  { %v1082_v51 = vld [vmem:[%s1697_s6] ss:$0 sm:$0xff] }
  0x28   :  { %v1083_v53 = vld [vmem:[%s1698_s7] ss:$0 sm:$0xff] }
  0x29   :  { %v88_v4 = vld [vmem:[%s1713_s27] sm:$0xff]  ;;  %v89_v5 = vld [vmem:[%s1713_s27 + $0x8] sm:$0xff]  ;;  %s1461_s27 = smov [#allocation8]  }
  0x2a   :  { %v90_v6 = vpack.c.bf16 %v89_v5, %v88_v4  ;;  %v83_v7 = vld [vmem:[%s1714_s18] sm:$0xff]  ;;  %v84_v8 = vld [vmem:[%s1714_s18 + $0x8] sm:$0xff]  ;;  %s1030_s28 = sshll.u32 %s1461_s27, 4  ;;  %s1031_s28 = int_to_ptr.vmem [resolvable:$true] %s1030_s28 }
  0x2b   :  { %v85_v9 = vpack.c.bf16 %v84_v8, %v83_v7  ;;  %v1084_v2 = vld [vmem:[%s1700_s9] ss:$0 sm:$0xff]  ;;  %s1362_s29 = scalar_lea.vmem %s1031_s28, 512  ;;  %p1367_p11 = scmp.lt.s32.totalorder %s1031_s28, %s1031_s28 }
  0x2c   :  { %1159 = vmatmul.mubr.msk.bf16.vlgmr.msra.gmra.mxu0 %vm92_vm2, %v90_v6  ;;  %p1363_p10 = scmp.ne.s32.totalorder %s1031_s28, %s1362_s29  ;;  %p1368_p12 = scmp.lt.s32.totalorder %s1362_s29, %s1362_s29 }
  0x2d   :  { %1165 = vmatmul.mubr.msk.bf16.vlgmr.msra.gmra.mxu1 %vm147_vm3, %v85_v9  ;;  %1184 = vmatprep.mubr.msk.bf16.mxu0 %vm1459_vm0, %v1458_v0 }
  0x2e   :  { %1169 = vmatpush3.bf16.msra.mxu0 %v1206_v25  ;;  %v1237_v25 = vld [vmem:[#allocation5 + $0xcc] ss:$24 sps:$4 sm:$0xff]   ;;  %p1369_p13 = por %p1368_p12, %p1367_p11 }
  0x2f   :  { %1170 = vmatprep.subr.bf16.mxu0 %v1458_v0 }
  0x30   :  { %p1370_p0 = pnand %p1369_p13, %p1363_p10 }
  0x32   :  { %1171 = vmatpush3.bf16.msra.mxu0 %v1207_v26  ;;  %v1235_v26 = vld [vmem:[#allocation5 + $0xc8] ss:$24 sps:$4 sm:$0xff]  }
  0x33   :  { %1172 = vmatprep.subr.bf16.mxu0 %v1458_v0 }
  0x36   :  { %1173 = vmatpush3.bf16.msra.mxu0 %v1208_v27  ;;  %v1240_v27 = vld [vmem:[#allocation5 + $0x94] ss:$24 sps:$4 sm:$0xff]  }
  0x37   :  { %1174 = vmatprep.subr.bf16.mxu0 %v1458_v0 }
  0x3a   :  { %1175 = vmatpush3.bf16.msra.mxu0 %v1209_v28  ;;  %v1243_v28 = vld [vmem:[#allocation5 + $0x9c] ss:$24 sps:$4 sm:$0xff]  }
  0x3b   :  { %1176 = vmatprep.subr.bf16.mxu0 %v1458_v0 }
  0x3e   :  { %1177 = vmatpush3.bf16.msra.mxu0 %v1210_v29  ;;  %v1238_v29 = vld [vmem:[#allocation5 + $0x90] ss:$24 sps:$4 sm:$0xff]  }
  0x3f   :  { %1178 = vmatprep.subr.bf16.mxu0 %v1458_v0 }
  0x42   :  { %1179 = vmatpush3.bf16.msra.mxu0 %v1211_v30  ;;  %v1241_v30 = vld [vmem:[#allocation5 + $0x98] ss:$24 sps:$4 sm:$0xff]  }
  0x43   :  { %1180 = vmatprep.subr.bf16.mxu0 %v1458_v0 }
  0x46   :  { %1181 = vmatpush3.bf16.msra.mxu0 %v1212_v31  ;;  %v1246_v31 = vld [vmem:[#allocation5 + $0x64] ss:$24 sps:$4 sm:$0xff]  }
  0x47   :  { %1182 = vmatprep.subr.bf16.mxu0 %v1458_v0 }
  0x4a   :  { %1183 = vmatpush3.bf16.msra.mxu0 %v1213_v32  ;;  %v1249_v32 = vld [vmem:[#allocation5 + $0x6c] ss:$24 sps:$4 sm:$0xff]  }
  0xec   :  { %v134_v10 = vpop.f32.mrf.mxu0 }
  0xed   :  { %v185_v11 = vpop.f32.mrf.mxu1 }
  0xee   :  { %v186_v13 = vadd.f32 %v185_v11, %v134_v10  ;;  %v1160_v14 = vpop.f32.mrf.mxu0  ;;  %v1216_v11 = vld [vmem:[#allocation5 + $0x154] ss:$24 sps:$4 sm:$0xff]  }
  0xef   :  { %v1166_v15 = vpop.f32.mrf.mxu1  ;;  %739 = vmatprep.subr.bf16.mxu1 %v1216_v11  ;;  %v1217_v14 = vld [vmem:[#allocation5 + $0x158] ss:$24 sps:$4 sm:$0xff]  }
  0xf0   :  { %v199_v16 = vadd.f32 %v1081_v12, %v186_v13  ;;  %v137_v17 = vpop.f32.mrf.mxu0  ;;  %v1219_v13 = vld [vmem:[#allocation5 + $0x15c] ss:$24 sps:$4 sm:$0xff]  }
  0xf1   :  { %v188_v18 = vpop.f32.mrf.mxu1  ;;  %782 = vmatprep.subr.bf16.mxu0 %v1219_v13  ;;  %v1222_v15 = vld [vmem:[#allocation5 + $0x124] ss:$24 sps:$4 sm:$0xff]  }
  0xf2   :  { %v189_v19 = vadd.f32 %v188_v18, %v137_v17  ;;  %v1161_v20 = vpop.f32.mrf.mxu0  ;;  %203 = vadd.xlane.f32.xlu0 %v199_v16  ;;  %v209_v21 = vmul.f32 %v199_v16, %v199_v16  ;;  %v1225_v17 = vld [vmem:[#allocation5 + $0x12c] ss:$24 sps:$4 sm:$0xff]   ;;  %v1223_v18 = vld [vmem:[#allocation5 + $0x128] ss:$24 sps:$4 sm:$0xff]  }
  0xf3   :  { %v1167_v22 = vpop.f32.mrf.mxu1  ;;  %v1226_v20 = vld [vmem:[#allocation5 + $0xf0] ss:$24 sps:$4 sm:$0xff]  }
  0xf4   :  { %v200_v23 = vadd.f32 %v1081_v12, %v189_v19  ;;  %211 = vadd.xlane.f32.xlu1 %v209_v21  ;;  %v1214_v12 = vld [vmem:[#allocation5 + $0x150] ss:$24 sps:$4 sm:$0xff]   ;;  %v1228_v19 = vld [vmem:[#allocation5 + $0xf4] ss:$24 sps:$4 sm:$0xff]  }
  0xf5   :  { %740 = vmatpush1.bf16.msra.mxu1 %v1214_v12  ;;  %v1231_v21 = vld [vmem:[#allocation5 + $0xfc] ss:$24 sps:$4 sm:$0xff]   ;;  %v1229_v22 = vld [vmem:[#allocation5 + $0xf8] ss:$24 sps:$4 sm:$0xff]  }
  0xf6   :  { %205 = vadd.xlane.f32.xlu0 %v200_v23  ;;  %v210_v24 = vmul.f32 %v200_v23, %v200_v23  ;;  %741 = vmatprep.subr.bf16.mxu1 %v1222_v15  ;;  %v1262_v12 = vld [vmem:[#allocation5 + $0x160] ss:$24 sps:$4 sm:$0xff]  }
  0xf8   :  { %213 = vadd.xlane.f32.xlu1 %v210_v24  ;;  %v1232_v24 = vld [vmem:[#allocation5 + $0xc0] ss:$24 sps:$4 sm:$0xff]  }
 0x17b   :  { %v204_v33 = vpop.xlane.xlu0 %203 }
 0x17c   :  { %v207_v34 = vmul.f32 0.015625, %v204_v33  ;;  %v1460_v33 = vmov 0  }
 0x17d   :  { %v212_v35 = vpop.xlane.xlu1 %211  ;;  %771 = vmatprep.mubr.bf16.mxu1 %v1460_v33  ;;  %1203 = vset.pattern.permute.xlu0 %v1460_v33 }
 0x17e   :  { %v217_v36 = vmul.f32 %v207_v34, %v207_v34  ;;  %v215_v37 = vmul.f32 0.015625, %v212_v35  ;;  %v223_v49 = vsub.f32 %v199_v16, %v207_v34  ;;  %v1220_v16 = vld [vmem:[#allocation5 + $0x120] ss:$24 sps:$4 sm:$0xff]   ;;  %1204 = vset.pattern.permute.xlu1 %v1460_v33 }
 0x17f   :  { %v206_v38 = vpop.xlane.xlu0 %205  ;;  %742 = vmatpush1.bf16.msra.mxu1 %v1220_v16  ;;  %v1244_v34 = vld [vmem:[#allocation5 + $0x60] ss:$24 sps:$4 sm:$0xff]   ;;  %v1267_v16 = vld [vmem:[#allocation5 + $0x134] ss:$24 sps:$4 sm:$0xff]  }
 0x180   :  { %v219_v39 = vsub.f32 %v215_v37, %v217_v36  ;;  %v208_v40 = vmul.f32 0.015625, %v206_v38  ;;  %743 = vmatprep.subr.bf16.mxu1 %v1228_v19  ;;  %v1247_v35 = vld [vmem:[#allocation5 + $0x68] ss:$24 sps:$4 sm:$0xff]   ;;  %v1252_v36 = vld [vmem:[#allocation5 + $0x34] ss:$24 sps:$4 sm:$0xff]  }
 0x181   :  { %v214_v41 = vpop.xlane.xlu1 %213  ;;  %v1255_v37 = vld [vmem:[#allocation5 + $0x3c] ss:$24 sps:$4 sm:$0xff]   ;;  %v1250_v38 = vld [vmem:[#allocation5 + $0x30] ss:$24 sps:$4 sm:$0xff]  }
 0x182   :  { %v221_v42 = vmax.f32 %v219_v39, 0.0  ;;  %v218_v43 = vmul.f32 %v208_v40, %v208_v40  ;;  %v216_v44 = vmul.f32 0.015625, %v214_v41  ;;  %v224_v54 = vsub.f32 %v200_v23, %v208_v40  ;;  %v1234_v23 = vld [vmem:[#allocation5 + $0xc4] ss:$24 sps:$4 sm:$0xff]   ;;  %v1253_v39 = vld [vmem:[#allocation5 + $0x38] ss:$24 sps:$4 sm:$0xff]  }
 0x183   :  { %744 = vmatpush1.bf16.msra.mxu1 %v1226_v20  ;;  %v1258_v40 = vld [vmem:[#allocation5 + $0x4] ss:$24 sps:$4 sm:$0xff]   ;;  %v1273_v19 = vld [vmem:[#allocation5 + $0xd4] ss:$24 sps:$4 sm:$0xff]   ;;  %v1271_v20 = vld [vmem:[#allocation5 + $0xd0] ss:$24 sps:$4 sm:$0xff]  }
 0x184   :  { %v225_v45 = vadd.f32 1e-05, %v221_v42  ;;  %v220_v46 = vsub.f32 %v216_v44, %v218_v43  ;;  %745 = vmatprep.subr.bf16.mxu1 %v1234_v23  ;;  %v1261_v41 = vld [vmem:[#allocation5 + $0xc] ss:$24 sps:$4 sm:$0xff]   ;;  %v1256_v42 = vld [vmem:[#allocation5] ss:$24 sps:$4 sm:$0xff]  }
 0x185   :  { %v1259_v43 = vld [vmem:[#allocation5 + $0x8] ss:$24 sps:$4 sm:$0xff]   ;;  %v1264_v44 = vld [vmem:[#allocation5 + $0x164] ss:$24 sps:$4 sm:$0xff]   ;;  %v1279_v23 = vld [vmem:[#allocation5 + $0x74] ss:$24 sps:$4 sm:$0xff]  }
 0x186   :  { %1286 = vrsqrt.f32 %v225_v45  ;;  %v222_v47 = vmax.f32 %v220_v46, 0.0 }
 0x187   :  { %746 = vmatpush1.bf16.msra.mxu1 %v1232_v24  ;;  %v1277_v24 = vld [vmem:[#allocation5 + $0x70] ss:$24 sps:$4 sm:$0xff]  }
 0x188   :  { %v226_v48 = vadd.f32 1e-05, %v222_v47  ;;  %747 = vmatprep.subr.bf16.mxu1 %v1240_v27  ;;  %v1285_v27 = vld [vmem:[#allocation5 + $0x14] ss:$24 sps:$4 sm:$0xff]  }
 0x18a   :  { %1288 = vrsqrt.f32 %v226_v48 }
 0x18b   :  { %748 = vmatpush1.bf16.msra.mxu1 %v1238_v29  ;;  %v469_v29 = vlaneseq }
 0x18c   :  { %749 = vmatprep.subr.bf16.mxu1 %v1246_v31 }
 0x18f   :  { %750 = vmatpush1.bf16.msra.mxu1 %v1244_v34 }
 0x190   :  { %751 = vmatprep.subr.bf16.mxu1 %v1252_v36 }
 0x193   :  { %v1287_v50 = vpop.eup %1286  ;;  %752 = vmatpush1.bf16.msra.mxu1 %v1250_v38 }
 0x194   :  { %v229_v52 = vmul.f32 %v1287_v50, %v223_v49  ;;  %753 = vmatprep.subr.bf16.mxu1 %v1258_v40 }
 0x196   :  { %v237_v55 = vmul.f32 %v1082_v51, %v229_v52 }
 0x197   :  { %v1289_v56 = vpop.eup %1288  ;;  %754 = vmatpush1.bf16.msra.mxu1 %v1256_v42 }
 0x198   :  { %v230_v57 = vmul.f32 %v1289_v56, %v224_v54  ;;  %v245_v58 = vadd.f32 %v1083_v53, %v237_v55  ;;  %825 = vmatprep.subr.bf16.mxu1 %v1264_v44 }
 0x19a   :  { %v238_v59 = vmul.f32 %v1082_v51, %v230_v57  ;;  %v249_v61 = vmul.f32 0.01, %v245_v58  ;;  %vm247_vm4 = vcmp.ge.f32.partialorder %v245_v58, 0.0 }
 0x19c   :  { %v246_v60 = vadd.f32 %v1083_v53, %v238_v59  ;;  %v251_v63 = vsel %vm247_vm4, %v245_v58, %v249_v61 }
 0x19e   :  { %vm248_vm5 = vcmp.ge.f32.partialorder %v246_v60, 0.0  ;;  %v250_v62 = vmul.f32 0.01, %v246_v60 }
 0x1a0   :  { %v252_v0 = vsel %vm248_vm5, %v246_v60, %v250_v62 }
 0x1a1   :  { %v253_v1 = vpack.c.bf16 %v252_v0, %v251_v63  ;;  %v1093_v63 = vld [vmem:[%s1701_s10] ss:$0 sm:$0xff] }
 0x1a3   :  { %1185 = vmatmul.mubr.bf16.vlgmr.msra.gmra.mxu0 %v253_v1  ;;  %v1094_v1 = vld [vmem:[%s1702_s11] ss:$0 sm:$0xff] }
 0x1a4   :  { %783 = vmatpush1.bf16.msra.mxu0 %v1217_v14  ;;  %814 = vmatprep.mubr.bf16.mxu0 %v1460_v33 }
 0x1a5   :  { %784 = vmatprep.subr.bf16.mxu0 %v1225_v17  ;;  %v1265_v17 = vld [vmem:[#allocation5 + $0x130] ss:$24 sps:$4 sm:$0xff]  }
 0x1a8   :  { %785 = vmatpush1.bf16.msra.mxu0 %v1223_v18  ;;  %v1268_v18 = vld [vmem:[#allocation5 + $0x100] ss:$24 sps:$4 sm:$0xff]  }
 0x1a9   :  { %786 = vmatprep.subr.bf16.mxu0 %v1231_v21  ;;  %v1276_v21 = vld [vmem:[#allocation5 + $0xa4] ss:$24 sps:$4 sm:$0xff]  }
 0x1ac   :  { %787 = vmatpush1.bf16.msra.mxu0 %v1229_v22  ;;  %v1274_v22 = vld [vmem:[#allocation5 + $0xa0] ss:$24 sps:$4 sm:$0xff]  }
 0x1ad   :  { %788 = vmatprep.subr.bf16.mxu0 %v1237_v25  ;;  %v1282_v25 = vld [vmem:[#allocation5 + $0x44] ss:$24 sps:$4 sm:$0xff]  }
 0x1b0   :  { %789 = vmatpush1.bf16.msra.mxu0 %v1235_v26  ;;  %v1280_v26 = vld [vmem:[#allocation5 + $0x40] ss:$24 sps:$4 sm:$0xff]  }
 0x1b1   :  { %790 = vmatprep.subr.bf16.mxu0 %v1243_v28  ;;  %v1283_v28 = vld [vmem:[#allocation5 + $0x10] ss:$24 sps:$4 sm:$0xff]  }
 0x1b4   :  { %791 = vmatpush1.bf16.msra.mxu0 %v1241_v30  ;;  %v470_v30 = vshrl.u32 %v469_v29, 7 }
 0x1b5   :  { %792 = vmatprep.subr.bf16.mxu0 %v1249_v32  ;;  %v467_v32 = vld [vmem:[%s1704_s13] sm:$0x3f] }
 0x1b6   :  { %v479_v31 = vsub.s32 2, %v470_v30  ;;  %v475_v34 = vsub.s32 1, %v470_v30  ;;  %v471_v36 = vsub.s32 0, %v470_v30 }
 0x1b8   :  { %793 = vmatpush1.bf16.msra.mxu0 %v1247_v35  ;;  %v483_v35 = vsub.s32 3, %v470_v30 }
 0x1b9   :  { %794 = vmatprep.subr.bf16.mxu0 %v1255_v37  ;;  %v480_v37 = vrot.slane %v467_v32, %v479_v31 }
 0x1ba   :  { %v484_v40 = vrot.slane %v467_v32, %v483_v35 }
 0x1bc   :  { %795 = vmatpush1.bf16.msra.mxu0 %v1253_v39  ;;  %v476_v39 = vrot.slane %v467_v32, %v475_v34 }
 0x1bd   :  { %796 = vmatprep.subr.bf16.mxu0 %v1261_v41  ;;  %v472_v41 = vrot.slane %v467_v32, %v471_v36 }
 0x1c0   :  { %797 = vmatpush1.bf16.msra.mxu0 %v1259_v43 }
 0x263   :  { %v359_v3 = vpop.f32.mrf.mxu0 }
 0x264   :  { %v1609_v4 = vadd.f32 %v1084_v2, %v359_v3 }
 0x265   :  { %v1186_v5 = vpop.f32.mrf.mxu0 }
 0x266   :  { %368 = vadd.xlane.f32.xlu0 %v1609_v4  ;;  %v374_v8 = vmul.f32 %v1609_v4, %v1609_v4 }
 0x267   :  { %v362_v6 = vpop.f32.mrf.mxu0 }
 0x268   :  { %v1612_v7 = vadd.f32 %v1084_v2, %v362_v6 }
 0x269   :  { %v1187_v9 = vpop.f32.mrf.mxu0 }
 0x26a   :  { %376 = vadd.xlane.f32.xlu0 %v374_v8  ;;  %370 = vadd.xlane.f32.xlu1 %v1612_v7  ;;  %v375_v10 = vmul.f32 %v1612_v7, %v1612_v7 }
 0x26e   :  { %378 = vadd.xlane.f32.xlu1 %v375_v10 }
 0x2ef   :  { %v369_v45 = vpop.xlane.xlu0 %368 }
 0x2f0   :  { %v372_v46 = vmul.f32 0.03125, %v369_v45 }
 0x2f2   :  { %v382_v49 = vmul.f32 %v372_v46, %v372_v46  ;;  %v388_v61 = vsub.f32 %v1609_v4, %v372_v46 }
 0x2f3   :  { %v377_v47 = vpop.xlane.xlu0 %376  ;;  %v371_v48 = vpop.xlane.xlu1 %370 }
 0x2f4   :  { %v380_v50 = vmul.f32 0.03125, %v377_v47  ;;  %v373_v51 = vmul.f32 0.03125, %v371_v48 }
 0x2f6   :  { %v384_v52 = vsub.f32 %v380_v50, %v382_v49  ;;  %v383_v55 = vmul.f32 %v373_v51, %v373_v51  ;;  %v389_v2 = vsub.f32 %v1612_v7, %v373_v51  ;;  %v1270_v7 = vld [vmem:[#allocation5 + $0x104] ss:$24 sps:$4 sm:$0xff]  }
 0x2f7   :  { %v379_v53 = vpop.xlane.xlu1 %378 }
 0x2f8   :  { %v386_v54 = vmax.f32 %v384_v52, 0.0  ;;  %v381_v56 = vmul.f32 0.03125, %v379_v53 }
 0x2fa   :  { %v390_v57 = vadd.f32 1e-05, %v386_v54  ;;  %v385_v58 = vsub.f32 %v381_v56, %v383_v55 }
 0x2fc   :  { %1290 = vrsqrt.f32 %v390_v57  ;;  %v387_v59 = vmax.f32 %v385_v58, 0.0 }
 0x2fe   :  { %v391_v60 = vadd.f32 1e-05, %v387_v59 }
 0x300   :  { %1292 = vrsqrt.f32 %v391_v60 }
 0x309   :  { %v1291_v62 = vpop.eup %1290 }
 0x30a   :  { %v394_v0 = vmul.f32 %v1291_v62, %v388_v61  ;;  %v487_v62 = vsub.s32 4, %v470_v30 }
 0x30c   :  { %v402_v3 = vmul.f32 %v1093_v63, %v394_v0  ;;  %v488_v0 = vrot.slane %v467_v32, %v487_v62 }
 0x30d   :  { %v1293_v5 = vpop.eup %1292 }
 0x30e   :  { %v395_v6 = vmul.f32 %v1293_v5, %v389_v2  ;;  %v410_v8 = vadd.f32 %v1094_v1, %v402_v3 }
 0x310   :  { %v403_v9 = vmul.f32 %v1093_v63, %v395_v6  ;;  %v414_v11 = vmul.f32 0.01, %v410_v8  ;;  %vm412_vm6 = vcmp.ge.f32.partialorder %v410_v8, 0.0  ;;  %v491_v63 = vsub.s32 5, %v470_v30 }
 0x312   :  { %v411_v10 = vadd.f32 %v1094_v1, %v403_v9  ;;  %v416_v13 = vsel %vm412_vm6, %v410_v8, %v414_v11  ;;  %v492_v1 = vrot.slane %v467_v32, %v491_v63 }
 0x314   :  { %vm413_vm7 = vcmp.ge.f32.partialorder %v411_v10, 0.0  ;;  %v415_v4 = vmul.f32 0.01, %v411_v10 }
 0x316   :  { %v417_v14 = vsel %vm413_vm7, %v411_v10, %v415_v4 }
 0x317   :  { %v418_v15 = vpack.c.bf16 %v417_v14, %v416_v13 }
 0x319   :  { %772 = vmatmul.mubr.bf16.vlgmr.msra.gmra.mxu1 %v418_v15  ;;  %815 = vmatmul.mubr.bf16.vlgmr.msra.gmra.mxu0 %v418_v15 }
 0x31a   :  { %826 = vmatpush1.bf16.msra.mxu1 %v1262_v12  ;;  %857 = vmatprep.mubr.bf16.mxu1 %v1460_v33  ;;  %v869_v33 = vand.u32 127, %v469_v29 }
 0x31b   :  { %827 = vmatprep.subr.bf16.mxu1 %v1267_v16 }
 0x31c   :  { %v870_v38 = vadd.s32 128, %v869_v33 }
 0x31e   :  { %828 = vmatpush1.bf16.msra.mxu1 %v1265_v17  ;;  %vm872_vm8 = vcmp.lt.s32.totalorder %v870_v38, 200 }
 0x31f   :  { %829 = vmatprep.subr.bf16.mxu1 %v1270_v7 }
 0x322   :  { %830 = vmatpush1.bf16.msra.mxu1 %v1268_v18 }
 0x323   :  { %831 = vmatprep.subr.bf16.mxu1 %v1273_v19 }
 0x326   :  { %832 = vmatpush1.bf16.msra.mxu1 %v1271_v20 }
 0x327   :  { %833 = vmatprep.subr.bf16.mxu1 %v1276_v21 }
 0x32a   :  { %834 = vmatpush1.bf16.msra.mxu1 %v1274_v22 }
 0x32b   :  { %835 = vmatprep.subr.bf16.mxu1 %v1279_v23 }
 0x32e   :  { %836 = vmatpush1.bf16.msra.mxu1 %v1277_v24 }
 0x32f   :  { %837 = vmatprep.subr.bf16.mxu1 %v1282_v25 }
 0x332   :  { %838 = vmatpush1.bf16.msra.mxu1 %v1280_v26 }
 0x333   :  { %839 = vmatprep.subr.bf16.mxu1 %v1285_v27 }
 0x336   :  { %840 = vmatpush1.bf16.msra.mxu1 %v1283_v28 }
 0x339   :  { %858 = vmatmul.mubr.bf16.vlgmr.msra.gmra.mxu1 %v418_v15 }
 0x3d9   :  { %v773_v42 = vpop.f32.mrf.mxu1  ;;  %v816_v43 = vpop.f32.mrf.mxu0 }
 0x3da   :  { %v817_v44 = vadd.f32 %v816_v43, %v480_v37  ;;  %v1635_v49 = vadd.f32 %v773_v42, %v472_v41 }
 0x3db   :  { %v775_v45 = vpop.f32.mrf.mxu1  ;;  %v818_v46 = vpop.f32.mrf.mxu0 }
 0x3dc   :  { %1009 = vst [vmem:[#allocation11] sm:$0xff] %v817_v44  ;;  %v776_v47 = vadd.f32 %v775_v45, %v476_v39  ;;  %v819_v48 = vadd.f32 %v818_v46, %v484_v40 }
 0x3dd   :  { %v777_v50 = vpop.f32.mrf.mxu1  ;;  %v820_v51 = vpop.f32.mrf.mxu0 }
 0x3de   :  { %1010 = vst [vmem:[#allocation11 + $0x8] sm:$0xff] %v819_v48  ;;  %v821_v52 = vadd.f32 %v820_v51, %v480_v37  ;;  %v1638_v53 = vsel %vm872_vm8, %v776_v47, -1e+30  ;;  %v1642_v59 = vadd.f32 %v777_v50, %v472_v41 }
 0x3df   :  { %v779_v54 = vpop.f32.mrf.mxu1  ;;  %v822_v55 = vpop.f32.mrf.mxu0  ;;  %v881_v56 = vmax.f32 %v1635_v49, %v1638_v53 }
 0x3e0   :  { %1011 = vst [vmem:[#allocation11 + $0x10] sm:$0xff] %v821_v52  ;;  %v780_v57 = vadd.f32 %v779_v54, %v476_v39  ;;  %v823_v58 = vadd.f32 %v822_v55, %v484_v40 }
 0x3e1   :  { %882 = vmax.xlane.f32.xlu0 %v881_v56 }
 0x3e2   :  { %1012 = vst [vmem:[#allocation11 + $0x18] sm:$0xff] %v823_v58  ;;  %v1645_v60 = vsel %vm872_vm8, %v780_v57, -1e+30 }
 0x3e3   :  { %v884_v61 = vmax.f32 %v1642_v59, %v1645_v60 }
 0x3e5   :  { %885 = vmax.xlane.f32.xlu1 %v884_v61 }
 0x3f9   :  { %v859_v2 = vpop.f32.mrf.mxu1 }
 0x3fa   :  { %v860_v3 = vadd.f32 %v859_v2, %v488_v0 }
 0x3fb   :  { %v861_v5 = vpop.f32.mrf.mxu1 }
 0x3fc   :  { %v921_v6 = vand.u32 2147483647, %v860_v3  ;;  %v862_v8 = vadd.f32 %v861_v5, %v492_v1  ;;  %v917_v43 = vmax.f32 %v860_v3, 0.0 }
 0x3fd   :  { %v863_v9 = vpop.f32.mrf.mxu1 }
 0x3fe   :  { %v925_v10 = vsub.f32 0.0, %v921_v6  ;;  %v922_v11 = vand.u32 2147483647, %v862_v8  ;;  %v1649_v4 = vadd.f32 %v863_v9, %v488_v0  ;;  %v918_v51 = vmax.f32 %v862_v8, 0.0 }
 0x3ff   :  { %v865_v12 = vpop.f32.mrf.mxu1 }
 0x400   :  { %v929_v13 = vmul.f32 1.442695, %v925_v10  ;;  %v926_v14 = vsub.f32 0.0, %v922_v11  ;;  %v923_v15 = vand.u32 2147483647, %v1649_v4  ;;  %v1652_v16 = vadd.f32 %v865_v12, %v492_v1 }
 0x401   :  { %v919_v62 = vmax.f32 %v1649_v4, 0.0 }
 0x402   :  { %1294 = vpow2.f32 %v929_v13  ;;  %v931_v17 = vmul.f32 1.442695, %v926_v14  ;;  %v927_v7 = vsub.f32 0.0, %v923_v15  ;;  %v924_v18 = vand.u32 2147483647, %v1652_v16 }
 0x403   :  { %v920_v6 = vmax.f32 %v1652_v16, 0.0 }
 0x404   :  { %1296 = vpow2.f32 %v931_v17  ;;  %v933_v19 = vmul.f32 1.442695, %v927_v7  ;;  %v928_v20 = vsub.f32 0.0, %v924_v18 }
 0x406   :  { %1298 = vpow2.f32 %v933_v19  ;;  %v935_v21 = vmul.f32 1.442695, %v928_v20 }
 0x408   :  { %1300 = vpow2.f32 %v935_v21 }
 0x40f   :  { %v1295_v22 = vpop.eup %1294 }
 0x410   :  { %v937_v23 = vadd.f32 1.0, %v1295_v22  ;;  %v940_v30 = vmul.f32 -0.5, %v1295_v22  ;;  %v943_v34 = vand.u32 2147483647, %v1295_v22 }
 0x411   :  { %v1297_v24 = vpop.eup %1296 }
 0x412   :  { %1302 = vlog2.f32 %v937_v23  ;;  %v946_v25 = vadd.f32 1.0, %v1297_v24  ;;  %v949_v31 = vmul.f32 -0.5, %v1297_v24  ;;  %v941_v32 = vadd.f32 1.0, %v940_v30 }
 0x413   :  { %v1299_v26 = vpop.eup %1298  ;;  %v952_v37 = vand.u32 2147483647, %v1297_v24  ;;  %vm944_vm9 = vcmp.lt.f32.partialorder %v943_v34, 0.0004427343 }
 0x414   :  { %1304 = vlog2.f32 %v946_v25  ;;  %v955_v27 = vadd.f32 1.0, %v1299_v26  ;;  %v958_v33 = vmul.f32 -0.5, %v1299_v26  ;;  %v950_v35 = vadd.f32 1.0, %v949_v31 }
 0x415   :  { %v1301_v28 = vpop.eup %1300  ;;  %v942_v40 = vmul.f32 %v1295_v22, %v941_v32  ;;  %v961_v44 = vand.u32 2147483647, %v1299_v26  ;;  %vm953_vm10 = vcmp.lt.f32.partialorder %v952_v37, 0.0004427343 }
 0x416   :  { %1306 = vlog2.f32 %v955_v27  ;;  %v964_v29 = vadd.f32 1.0, %v1301_v28  ;;  %v967_v38 = vmul.f32 -0.5, %v1301_v28  ;;  %v959_v41 = vadd.f32 1.0, %v958_v33 }
 0x417   :  { %v951_v47 = vmul.f32 %v1297_v24, %v950_v35  ;;  %v970_v57 = vand.u32 2147483647, %v1301_v28  ;;  %vm962_vm11 = vcmp.lt.f32.partialorder %v961_v44, 0.0004427343  ;;  %v982_v24 = vld [vmem:[%s1693_s2 + $0x8] sm:$0xff] }
 0x418   :  { %1308 = vlog2.f32 %v964_v29  ;;  %v968_v52 = vadd.f32 1.0, %v967_v38  ;;  %v960_v56 = vmul.f32 %v1299_v26, %v959_v41 }
 0x419   :  { %vm971_vm12 = vcmp.lt.f32.partialorder %v970_v57, 0.0004427343 }
 0x41a   :  { %v969_v5 = vmul.f32 %v1301_v28, %v968_v52 }
 0x41f   :  { %v1303_v36 = vpop.eup %1302 }
 0x420   :  { %v939_v39 = vmul.f32 0.6931472, %v1303_v36 }
 0x421   :  { %v1305_v42 = vpop.eup %1304 }
 0x422   :  { %v945_v45 = vsel %vm944_vm9, %v942_v40, %v939_v39  ;;  %v948_v46 = vmul.f32 0.6931472, %v1305_v42 }
 0x423   :  { %v1307_v48 = vpop.eup %1306  ;;  %v973_v50 = vadd.f32 %v945_v45, %v917_v43 }
 0x424   :  { %v954_v54 = vsel %vm953_vm10, %v951_v47, %v948_v46  ;;  %v957_v55 = vmul.f32 0.6931472, %v1307_v48 }
 0x425   :  { %v977_v58 = vadd.f32 1e-08, %v973_v50  ;;  %v974_v61 = vadd.f32 %v954_v54, %v918_v51  ;;  %v1309_v63 = vpop.eup %1308 }
 0x426   :  { %v963_v0 = vsel %vm962_vm11, %v960_v56, %v957_v55  ;;  %v966_v3 = vmul.f32 0.6931472, %v1309_v63 }
 0x427   :  { %1001 = vst [vmem:[#allocation8] sm:$0xff] %v977_v58  ;;  %v978_v1 = vadd.f32 1e-08, %v974_v61  ;;  %v975_v2 = vadd.f32 %v963_v0, %v919_v62 }
 0x428   :  { %v972_v9 = vsel %vm971_vm12, %v969_v5, %v966_v3 }
 0x429   :  { %1002 = vst [vmem:[#allocation8 + $0x8] sm:$0xff] %v978_v1  ;;  %v979_v8 = vadd.f32 1e-08, %v975_v2  ;;  %v976_v10 = vadd.f32 %v972_v9, %v920_v6 }
 0x42b   :  { %1003 = vst [vmem:[#allocation8 + $0x10] sm:$0xff] %v979_v8  ;;  %v980_v11 = vadd.f32 1e-08, %v976_v10 }
 0x42d   :  { %1004 = vst [vmem:[#allocation8 + $0x18] sm:$0xff] %v980_v11 }
 0x46a   :  { %v883_v12 = vpop.xlane.xlu0 %882 }
 0x46b   :  { %v887_v4 = vsub.f32 %v1635_v49, %v883_v12  ;;  %v888_v13 = vsub.f32 %v1638_v53, %v883_v12 }
 0x46d   :  { %v891_v14 = vmul.f32 1.442695, %v887_v4  ;;  %v893_v15 = vmul.f32 1.442695, %v888_v13 }
 0x46e   :  { %v886_v17 = vpop.xlane.xlu1 %885 }
 0x46f   :  { %1310 = vpow2.f32 %v891_v14  ;;  %v889_v7 = vsub.f32 %v1642_v59, %v886_v17  ;;  %v890_v16 = vsub.f32 %v1645_v60, %v886_v17  ;;  %v981_v59 = vld [vmem:[%s1693_s2] sm:$0xff] }
 0x470   :  { %1312 = vpow2.f32 %v893_v15 }
 0x471   :  { %v895_v18 = vmul.f32 1.442695, %v889_v7  ;;  %v897_v19 = vmul.f32 1.442695, %v890_v16 }
 0x473   :  { %1314 = vpow2.f32 %v895_v18 }
 0x474   :  { %1316 = vpow2.f32 %v897_v19 }
 0x47c   :  { %v1311_v20 = vpop.eup %1310 }
 0x47d   :  { %v1313_v21 = vpop.eup %1312 }
 0x47e   :  { %v899_v22 = vadd.f32 %v1313_v21, %v1311_v20 }
 0x480   :  { %v1315_v23 = vpop.eup %1314  ;;  %900 = vadd.xlane.f32.xlu0 %v899_v22 }
 0x481   :  { %v1317_v49 = vpop.eup %1316 }
 0x482   :  { %v902_v53 = vadd.f32 %v1317_v49, %v1315_v23 }
 0x484   :  { %903 = vadd.xlane.f32.xlu1 %v902_v53 }
 0x495   :  { %990 = vperm.xlu1 %1204, %v982_v24  }
 0x496   :  { %985 = vperm.xlu0 %1203, %v981_v59  }
 0x497   :  { %1373 = shalt.err (!%p1370_p0)
}
 0x498   :  { %s1462_s0 = smov 256   ;;  %s1463_s30 = smov 16  }
 0x499   :  { %1036 = dma.vmem_to_hbm [thread:$0]  %s1031_s28, 512, %s1706_s15, [#allocation9], %s1462_s0, %s1462_s0, %s1463_s30  }
 0x49a   :  { %s1464_s2 = smov [#allocation11]  }
 0x49b   :  { %s1054_s19 = sshll.u32 %s1464_s2, 4  ;;  %s1055_s19 = int_to_ptr.vmem [resolvable:$true] %s1054_s19 }
 0x49c   :  { %s1382_s3 = scalar_lea.vmem %s1055_s19, 512  ;;  %p1387_p2 = scmp.lt.s32.totalorder %s1055_s19, %s1055_s19 }
 0x49d   :  { %p1383_p1 = scmp.ne.s32.totalorder %s1055_s19, %s1382_s3  ;;  %p1388_p3 = scmp.lt.s32.totalorder %s1382_s3, %s1382_s3 }
 0x49f   :  { %p1389_p4 = por %p1388_p3, %p1387_p2 }
 0x4a1   :  { %p1390_p5 = pnand %p1389_p4, %p1383_p1 }
 0x4a3   :  { %1393 = shalt.err (!%p1390_p5)
}
 0x4a4   :  { %1060 = dma.vmem_to_hbm [thread:$0]  %s1055_s19, 512, %s1708_s17, [#allocation12], %s1462_s0, %s1462_s0, %s1463_s30  }
 0x4a5   :  { %s1465_s15 = smov [#allocation7]   ;;  %s1466_s17 = smov [#allocation10]  }
 0x4a6   :  { %s1018_s20 = sshll.u32 %s1465_s15, 4  ;;  %s1042_s21 = sshll.u32 %s1466_s17, 4  ;;  %s1019_s20 = int_to_ptr.vmem [resolvable:$true] %s1018_s20  ;;  %s1043_s21 = int_to_ptr.vmem [resolvable:$true] %s1042_s21 }
 0x4a7   :  { %s1402_s22 = scalar_lea.vmem %s1019_s20, 512  ;;  %p1407_p7 = scmp.lt.s32.totalorder %s1019_s20, %s1019_s20 }
 0x4a8   :  { %p1403_p6 = scmp.ne.s32.totalorder %s1019_s20, %s1402_s22  ;;  %p1408_p8 = scmp.lt.s32.totalorder %s1402_s22, %s1402_s22 }
 0x4aa   :  { %p1409_p9 = por %p1408_p8, %p1407_p7 }
 0x4ac   :  { %p1410_p10 = pnand %p1409_p9, %p1403_p6 }
 0x509   :  { %v901_v60 = vpop.xlane.xlu0 %900 }
 0x50a   :  { %1318 = vrcp.f32 %v901_v60 }
 0x50d   :  { %v904_v25 = vpop.xlane.xlu1 %903 }
 0x50e   :  { %1320 = vrcp.f32 %v904_v25 }
 0x511   :  { %v986_v32 = vpop.permute.xlu0 %985  ;;  %v991_v39 = vpop.permute.xlu1 %990 }
 0x517   :  { %v1319_v26 = vpop.eup %1318 }
 0x518   :  { %v907_v27 = vmul.f32 %v1319_v26, %v901_v60 }
 0x51a   :  { %v909_v28 = vsub.f32 2.0, %v907_v27 }
 0x51b   :  { %v1321_v29 = vpop.eup %1320 }
 0x51c   :  { %v911_v30 = vmul.f32 %v1319_v26, %v909_v28  ;;  %v908_v31 = vmul.f32 %v1321_v29, %v904_v25 }
 0x51e   :  { %v910_v33 = vsub.f32 2.0, %v908_v31  ;;  %v913_v34 = vmul.f32 %v1311_v20, %v911_v30  ;;  %v914_v35 = vmul.f32 %v1313_v21, %v911_v30 }
 0x520   :  { %v912_v36 = vmul.f32 %v1321_v29, %v910_v33  ;;  %997 = vst [vmem:[#allocation7] sm:$0xff] %v913_v34  ;;  %998 = vst [vmem:[#allocation7 + $0x8] sm:$0xff] %v914_v35  ;;  %v993_v37 = vmul.f32 %v986_v32, %v913_v34  ;;  %v994_v38 = vmul.f32 %v986_v32, %v914_v35 }
 0x522   :  { %1005 = vst [vmem:[#allocation10] sm:$0xff] %v993_v37  ;;  %1006 = vst [vmem:[#allocation10 + $0x8] sm:$0xff] %v994_v38  ;;  %v915_v40 = vmul.f32 %v1315_v23, %v912_v36  ;;  %v916_v41 = vmul.f32 %v1317_v49, %v912_v36 }
 0x524   :  { %999 = vst [vmem:[#allocation7 + $0x10] sm:$0xff] %v915_v40  ;;  %1000 = vst [vmem:[#allocation7 + $0x18] sm:$0xff] %v916_v41  ;;  %v995_v42 = vmul.f32 %v991_v39, %v915_v40  ;;  %v996_v43 = vmul.f32 %v991_v39, %v916_v41 }
 0x525   :  { %1413 = shalt.err (!%p1410_p10)
}
 0x526   :  { %1024 = dma.vmem_to_hbm [thread:$0]  %s1019_s20, 512, %s1705_s14, [#allocation4], %s1462_s0, %s1462_s0, %s1463_s30   ;;  %1007 = vst [vmem:[#allocation10 + $0x10] sm:$0xff] %v995_v42  ;;  %1008 = vst [vmem:[#allocation10 + $0x18] sm:$0xff] %v996_v43 }
 0x527   :  { %s1422_s7 = scalar_lea.vmem %s1043_s21, 512  ;;  %p1427_p12 = scmp.lt.s32.totalorder %s1043_s21, %s1043_s21 }
 0x528   :  { %p1423_p11 = scmp.ne.s32.totalorder %s1043_s21, %s1422_s7  ;;  %p1428_p13 = scmp.lt.s32.totalorder %s1422_s7, %s1422_s7 }
 0x52a   :  { %p1429_p0 = por %p1428_p13, %p1427_p12 }
 0x52c   :  { %p1430_p1 = pnand %p1429_p0, %p1423_p11 }
 0x52e   :  { %1433 = shalt.err (!%p1430_p1)
}
 0x52f   :  { %1048 = dma.vmem_to_hbm [thread:$0]  %s1043_s21, 512, %s1707_s16, [#allocation9], %s1462_s0, %s1462_s0, %s1463_s30  }
 0x530   :  { %1446 = dma.done.wait [#allocation4], 512  }
 0x531   :  { %1447 = vsyncadd [#allocation4], 4294966784 }
 0x532   :  { %1448 = dma.done.wait [#allocation9], 1024  }
 0x533   :  { %1449 = vsyncadd [#allocation9], 4294966272 }
 0x534   :  { %1450 = dma.done.wait [#allocation12], 512  }
 0x535   :  { %1451 = vsyncadd [#allocation12], 4294966784 }
 0x536   :  { %1073 = vsyncpa [#allocation3], 1 }
 0x537   :  { %1074 = vsyncpa [#allocation6], 1 }
 0x538   :  { %1075 = vsyncpa [#allocation4], 1 }
 0x539   :  { %1076 = vsyncpa [#allocation9], 1 }
 0x53a   :  { %1077 = vsyncpa [#allocation12], 1 }

</bundles_post_ra>
